<compile_context>
chip_gen: v6e
topology: v6e:2x2x1
jax: 0.10.0
libtpu: 0.0.40
codegen_flags: <defaults>
</compile_context>

<pallas_src>
import functools

import jax
import jax.numpy as jnp
from jax.experimental import pallas as pl
from jax.experimental.pallas import tpu as pltpu


def _round_up(x, m):
    return (x + m - 1) // m * m


def _cdiv(a, b):
    return (a + b - 1) // b


def _backbone_fc_kernel(x_ref, w1_ref, b1_ref, w2_ref, b2_ref,
                        w3_ref, b3_ref, gamma_ref, beta_ref, o_ref,
                        *, matmul_dtype):
    # linear1 (dropout is identity in eval mode).  x arrives as f32 and is
    # cast to bf16 in VMEM; MXU accumulates in f32.  Bias adds / ReLU /
    # LayerNorm stay f32.
    x = x_ref[...].astype(matmul_dtype)
    h = jnp.dot(x, w1_ref[...],
                preferred_element_type=jnp.float32) + b1_ref[...]
    # linear2 + relu
    h = jnp.dot(h.astype(matmul_dtype), w2_ref[...],
                preferred_element_type=jnp.float32) + b2_ref[...]
    h = jnp.maximum(h, 0.0)
    # linear3 (dropout is identity in eval mode)
    h = jnp.dot(h.astype(matmul_dtype), w3_ref[...],
                preferred_element_type=jnp.float32) + b3_ref[...]

    # LayerNorm over the last dim (eps = 1e-5, affine), two-pass statistics
    # for numerical stability (matches PyTorch LayerNorm behaviour).
    mean = jnp.mean(h, axis=-1, keepdims=True)
    c = h - mean
    var = jnp.mean(c * c, axis=-1, keepdims=True)
    inv = jax.lax.rsqrt(var + 1e-5)
    y = c * inv * gamma_ref[...] + beta_ref[...]
    o_ref[...] = y.astype(o_ref.dtype)


def _const_spec(shape):
    """Full-array, grid-invariant BlockSpec; single-buffered when supported."""
    idx = lambda i: (0,) * len(shape)
    try:
        return pl.BlockSpec(shape, idx, pipeline_mode=pl.Buffered(1))
    except TypeError:
        # Older jax without pipeline_mode on BlockSpec — fall back gracefully.
        return pl.BlockSpec(shape, idx)


@functools.partial(jax.jit, static_argnames=("block_rows", "matmul_dtype"))
def kinet_backbone_fc(x2d, w1, b1, w2, b2, w3, b3, gamma, beta,
                      block_rows=None, matmul_dtype=jnp.bfloat16):
    """x2d: (N, input_dim) float32.  Weights already prepared (bf16, f32 biases).

    Returns (N, hidden) float32.
    """
    n, d_in = x2d.shape
    hidden = w1.shape[1]

    # ---- row tiling (static) ---------------------------------------------
    min_rows = 16  # bf16 vregs pack (16, 128); keep sublanes fully populated.
    if block_rows is None:
        if n <= 2 * min_rows:
            # Tiny N: a single (near-)exact tile.
            block_rows = _round_up(max(n, 1), min_rows)
        else:
            # Aim for ~512-row tiles but guarantee an even number of >= 2
            # grid steps (v7x megacore balance) and a nearly-full last tile.
            num_tiles = max(2, _cdiv(n, 512))
            if num_tiles % 2:
                num_tiles += 1
            block_rows = _round_up(_cdiv(n, num_tiles), min_rows)
    block_rows = max(min_rows, _round_up(block_rows, min_rows))

    n_pad = _round_up(n, block_rows)
    grid = (n_pad // block_rows,)

    # Pad rows only if needed (zero-pad; padded rows produce garbage LN rows
    # that are sliced off below — they never mix with valid rows).
    x_p = x2d if n_pad == n else jnp.pad(x2d, ((0, n_pad - n), (0, 0)))

    # ---- specs -------------------------------------------------------------
    # Last block dim equals the full array dim, so no 128-lane padding of x or
    # the output is required even for d_in/hidden like 32.
    row_spec_in = pl.BlockSpec((block_rows, d_in), lambda i: (i, 0))
    row_spec_out = pl.BlockSpec((block_rows, hidden), lambda i: (i, 0))

    kernel = functools.partial(_backbone_fc_kernel, matmul_dtype=matmul_dtype)

    # Advisory cost hint for XLA scheduling around the custom call.
    flops = 2 * n_pad * (d_in * hidden + 2 * hidden * hidden)
    bytes_accessed = (n_pad * d_in * 4 + n_pad * hidden * 4          # x, y (f32)
                      + 2 * (d_in * hidden + 2 * hidden * hidden)    # bf16 weights
                      + 4 * 5 * hidden)                              # biases/gamma/beta
    cost = pl.CostEstimate(flops=flops, transcendentals=n_pad,
                           bytes_accessed=bytes_accessed)

    out = pl.pallas_call(
        kernel,
        out_shape=jax.ShapeDtypeStruct((n_pad, hidden), x2d.dtype),
        grid_spec=pltpu.PrefetchScalarGridSpec(
            num_scalar_prefetch=0,
            grid=grid,
            in_specs=[row_spec_in,
                      _const_spec(w1.shape), _const_spec(b1.shape),
                      _const_spec(w2.shape), _const_spec(b2.shape),
                      _const_spec(w3.shape), _const_spec(b3.shape),
                      _const_spec(gamma.shape), _const_spec(beta.shape)],
            out_specs=row_spec_out,
        ),
        compiler_params=pltpu.CompilerParams(
            dimension_semantics=("parallel",),
            vmem_limit_bytes=32 * 1024 * 1024,  # safe on v5e/v6e/v7x
        ),
        cost_estimate=cost,
    )(x_p, w1, b1, w2, b2, w3, b3, gamma, beta)

    return out if n_pad == n else out[:n]


def prepare_params(params, matmul_dtype=jnp.bfloat16):
    """One-time parameter preparation (call once, OUTSIDE the per-step jit).

    Casts the weight matrices to the MXU dtype and makes biases / gamma /
    beta 2-D f32 row vectors, so no per-forward copy/cast passes remain.
    """
    w1, b1, w2, b2, w3, b3, gamma, beta = params

    def row(v):
        return jnp.asarray(v, jnp.float32).reshape(1, -1)

    return (jnp.asarray(w1, matmul_dtype), row(b1),
            jnp.asarray(w2, matmul_dtype), row(b2),
            jnp.asarray(w3, matmul_dtype), row(b3),
            row(gamma), row(beta))


def kinet_backbone_forward(x, mask, prepared_params):
    """Mirror of Kinet_Backbone.forward with return_interm_layers=False.

    x:    (batch, seq, input_dim)
    mask: (batch, seq)  — passed through untouched, as in NestedTensor.
    returns: dict {'0': (y, mask)} with y of shape (batch, seq, hidden).
    """
    b, s, d_in = x.shape
    x2d = x.reshape(b * s, d_in)
    y2d = kinet_backbone_fc(x2d, *prepared_params)
    hidden = prepared_params[0].shape[1]
    y = y2d.reshape(b, s, hidden)
    return {"0": (y, mask)}


def init_params(key, input_dim, hidden_dim):
    """Deterministic synthetic parameters (shapes match nn.Linear / nn.LayerNorm)."""
    ks = jax.random.split(key, 6)

    def lin(kw, kb, fan_in, fan_out):
        bound = 1.0 / jnp.sqrt(fan_in)
        w = jax.random.uniform(kw, (fan_in, fan_out), jnp.float32, -bound, bound)
        b = jax.random.uniform(kb, (1, fan_out), jnp.float32, -bound, bound)
        return w, b

    w1, b1 = lin(ks[0], ks[1], input_dim, hidden_dim)
    w2, b2 = lin(ks[2], ks[3], hidden_dim, hidden_dim)
    w3, b3 = lin(ks[4], ks[5], hidden_dim, hidden_dim)
    gamma = jnp.ones((1, hidden_dim), jnp.float32)
    beta = jnp.zeros((1, hidden_dim), jnp.float32)
    return (w1, b1, w2, b2, w3, b3, gamma, beta)


def _reference(x2d, w1, b1, w2, b2, w3, b3, gamma, beta,
               matmul_dtype=jnp.bfloat16):
    """Pure-JAX reference using the same bf16-in / f32-accumulate matmuls.

    Note: vs the original f32 PyTorch module, expect ~1e-3 relative error
    from the bf16 MXU inputs.
    """
    def mm(a, w):
        return jnp.dot(a.astype(matmul_dtype), w.astype(matmul_dtype),
                       preferred_element_type=jnp.float32)
    h = mm(x2d, w1) + b1
    h = jnp.maximum(mm(h, w2) + b2, 0.0)
    h = mm(h, w3) + b3
    mean = jnp.mean(h, -1, keepdims=True)
    var = jnp.mean(jnp.square(h - mean), -1, keepdims=True)
    return (h - mean) * jax.lax.rsqrt(var + 1e-5) * gamma + beta


if __name__ == "__main__":
    # Small shapes consistent with the module: Kinet_Backbone(input_dim=32,
    # hidden_dims=[32]) applied to a NestedTensor of (batch=2, seq=8, 32).
    batch, seq, input_dim, hidden = 2, 8, 32, 32

    key = jax.random.PRNGKey(0)
    kx, kp = jax.random.split(key)
    x = jax.random.normal(kx, (batch, seq, input_dim), jnp.float32)
    mask = jnp.zeros((batch, seq), jnp.bool_)
    params = init_params(kp, input_dim, hidden)
    prepared = prepare_params(params)   # one-time cast/reshape, outside jit

    out = kinet_backbone_forward(x, mask, prepared)
    y, m = out["0"]
    jax.block_until_ready(y)

    # correctness check against a pure-JAX reference with matching precision
    ref = _reference(x.reshape(-1, input_dim), *params).reshape(batch, seq, hidden)
    assert y.shape == (batch, seq, hidden)
    assert m.shape == (batch, seq)
    assert jnp.allclose(y, ref, atol=2e-3, rtol=2e-3), "mismatch vs reference"

    # TODO(synk): nn.Dropout is modeled as identity (eval-mode semantics);
    # stochastic training-mode dropout would need pltpu.prng_* in-kernel.
    print("KERNEL_OK")
</pallas_src>

<mosaic_0001>
module attributes {stable_mosaic.version = 11 : i64} {
  func.func @_backbone_fc_kernel(%arg0: i32, %arg1: memref<16x32xf32, #tpu.memory_space<vmem>>, %arg2: memref<32x32xbf16, #tpu.memory_space<vmem>>, %arg3: memref<1x32xf32, #tpu.memory_space<vmem>>, %arg4: memref<32x32xbf16, #tpu.memory_space<vmem>>, %arg5: memref<1x32xf32, #tpu.memory_space<vmem>>, %arg6: memref<32x32xbf16, #tpu.memory_space<vmem>>, %arg7: memref<1x32xf32, #tpu.memory_space<vmem>>, %arg8: memref<1x32xf32, #tpu.memory_space<vmem>>, %arg9: memref<1x32xf32, #tpu.memory_space<vmem>>, %arg10: memref<16x32xf32, #tpu.memory_space<vmem>>) attributes {dimension_semantics = [#tpu.dimension_semantics<parallel>], iteration_bounds = array<i64: 1>, scalar_prefetch = 0 : i64, scratch_operands = 0 : i64, tpu.core_type = #tpu.core_type<tc>, window_params = [{transform_indices = @transform_0, window_bounds = array<i64: 16, 32>}, {pipeline_mode = #tpu.pipeline_mode<synchronous>, transform_indices = @transform_1, window_bounds = array<i64: 32, 32>}, {pipeline_mode = #tpu.pipeline_mode<synchronous>, transform_indices = @transform_2, window_bounds = array<i64: 1, 32>}, {pipeline_mode = #tpu.pipeline_mode<synchronous>, transform_indices = @transform_3, window_bounds = array<i64: 32, 32>}, {pipeline_mode = #tpu.pipeline_mode<synchronous>, transform_indices = @transform_4, window_bounds = array<i64: 1, 32>}, {pipeline_mode = #tpu.pipeline_mode<synchronous>, transform_indices = @transform_5, window_bounds = array<i64: 32, 32>}, {pipeline_mode = #tpu.pipeline_mode<synchronous>, transform_indices = @transform_6, window_bounds = array<i64: 1, 32>}, {pipeline_mode = #tpu.pipeline_mode<synchronous>, transform_indices = @transform_7, window_bounds = array<i64: 1, 32>}, {pipeline_mode = #tpu.pipeline_mode<synchronous>, transform_indices = @transform_8, window_bounds = array<i64: 1, 32>}, {transform_indices = @transform_9, window_bounds = array<i64: 16, 32>}]} {
    %c0 = arith.constant 0 : index
    %c0_0 = arith.constant 0 : index
    %0 = vector.load %arg1[%c0, %c0_0] : memref<16x32xf32, #tpu.memory_space<vmem>>, vector<16x32xf32>
    %1 = arith.truncf %0 : vector<16x32xf32> to vector<16x32xbf16>
    %c0_1 = arith.constant 0 : index
    %c0_2 = arith.constant 0 : index
    %2 = vector.load %arg2[%c0_1, %c0_2] : memref<32x32xbf16, #tpu.memory_space<vmem>>, vector<32x32xbf16>
    %cst = arith.constant dense<0.000000e+00> : vector<16x32xf32>
    %3 = tpu.matmul %1, %2, %cst {dimension_numbers = #tpu.dot_dimension_numbers<[1], [0], [0], [1], [0, 0, 1, 1], [], []>} : vector<16x32xbf16>, vector<32x32xbf16>, vector<16x32xf32> -> vector<16x32xf32>
    %c0_3 = arith.constant 0 : index
    %c0_4 = arith.constant 0 : index
    %4 = vector.load %arg3[%c0_3, %c0_4] : memref<1x32xf32, #tpu.memory_space<vmem>>, vector<1x32xf32>
    %5 = vector.broadcast %4 : vector<1x32xf32> to vector<16x32xf32>
    %6 = arith.addf %3, %5 : vector<16x32xf32>
    %7 = arith.truncf %6 : vector<16x32xf32> to vector<16x32xbf16>
    %c0_5 = arith.constant 0 : index
    %c0_6 = arith.constant 0 : index
    %8 = vector.load %arg4[%c0_5, %c0_6] : memref<32x32xbf16, #tpu.memory_space<vmem>>, vector<32x32xbf16>
    %cst_7 = arith.constant dense<0.000000e+00> : vector<16x32xf32>
    %9 = tpu.matmul %7, %8, %cst_7 {dimension_numbers = #tpu.dot_dimension_numbers<[1], [0], [0], [1], [0, 0, 1, 1], [], []>} : vector<16x32xbf16>, vector<32x32xbf16>, vector<16x32xf32> -> vector<16x32xf32>
    %c0_8 = arith.constant 0 : index
    %c0_9 = arith.constant 0 : index
    %10 = vector.load %arg5[%c0_8, %c0_9] : memref<1x32xf32, #tpu.memory_space<vmem>>, vector<1x32xf32>
    %11 = vector.broadcast %10 : vector<1x32xf32> to vector<16x32xf32>
    %12 = arith.addf %9, %11 : vector<16x32xf32>
    %cst_10 = arith.constant 0.000000e+00 : f32
    %13 = vector.broadcast %cst_10 : f32 to vector<16x32xf32>
    %14 = arith.maximumf %12, %13 : vector<16x32xf32>
    %15 = arith.truncf %14 : vector<16x32xf32> to vector<16x32xbf16>
    %c0_11 = arith.constant 0 : index
    %c0_12 = arith.constant 0 : index
    %16 = vector.load %arg6[%c0_11, %c0_12] : memref<32x32xbf16, #tpu.memory_space<vmem>>, vector<32x32xbf16>
    %cst_13 = arith.constant dense<0.000000e+00> : vector<16x32xf32>
    %17 = tpu.matmul %15, %16, %cst_13 {dimension_numbers = #tpu.dot_dimension_numbers<[1], [0], [0], [1], [0, 0, 1, 1], [], []>} : vector<16x32xbf16>, vector<32x32xbf16>, vector<16x32xf32> -> vector<16x32xf32>
    %c0_14 = arith.constant 0 : index
    %c0_15 = arith.constant 0 : index
    %18 = vector.load %arg7[%c0_14, %c0_15] : memref<1x32xf32, #tpu.memory_space<vmem>>, vector<1x32xf32>
    %19 = vector.broadcast %18 : vector<1x32xf32> to vector<16x32xf32>
    %20 = arith.addf %17, %19 : vector<16x32xf32>
    %cst_16 = arith.constant dense<0.000000e+00> : vector<16xf32>
    %21 = vector.multi_reduction <add>, %20, %cst_16 [1] : vector<16x32xf32> to vector<16xf32>
    %22 = vector.shape_cast %21 : vector<16xf32> to vector<16x1xf32>
    %cst_17 = arith.constant 3.200000e+01 : f32
    %23 = vector.broadcast %cst_17 : f32 to vector<16x1xf32>
    %24 = arith.divf %22, %23 : vector<16x1xf32>
    %25 = vector.broadcast %24 : vector<16x1xf32> to vector<16x32xf32>
    %26 = arith.subf %20, %25 : vector<16x32xf32>
    %27 = arith.mulf %26, %26 : vector<16x32xf32>
    %cst_18 = arith.constant dense<0.000000e+00> : vector<16xf32>
    %28 = vector.multi_reduction <add>, %27, %cst_18 [1] : vector<16x32xf32> to vector<16xf32>
    %29 = vector.shape_cast %28 : vector<16xf32> to vector<16x1xf32>
    %cst_19 = arith.constant 3.200000e+01 : f32
    %30 = vector.broadcast %cst_19 : f32 to vector<16x1xf32>
    %31 = arith.divf %29, %30 : vector<16x1xf32>
    %cst_20 = arith.constant 9.99999974E-6 : f32
    %32 = vector.broadcast %cst_20 : f32 to vector<16x1xf32>
    %33 = arith.addf %31, %32 : vector<16x1xf32>
    %34 = math.rsqrt %33 : vector<16x1xf32>
    %35 = vector.broadcast %34 : vector<16x1xf32> to vector<16x32xf32>
    %36 = arith.mulf %26, %35 : vector<16x32xf32>
    %c0_21 = arith.constant 0 : index
    %c0_22 = arith.constant 0 : index
    %37 = vector.load %arg8[%c0_21, %c0_22] : memref<1x32xf32, #tpu.memory_space<vmem>>, vector<1x32xf32>
    %38 = vector.broadcast %37 : vector<1x32xf32> to vector<16x32xf32>
    %39 = arith.mulf %36, %38 : vector<16x32xf32>
    %c0_23 = arith.constant 0 : index
    %c0_24 = arith.constant 0 : index
    %40 = vector.load %arg9[%c0_23, %c0_24] : memref<1x32xf32, #tpu.memory_space<vmem>>, vector<1x32xf32>
    %41 = vector.broadcast %40 : vector<1x32xf32> to vector<16x32xf32>
    %42 = arith.addf %39, %41 : vector<16x32xf32>
    %c0_25 = arith.constant 0 : index
    %c0_26 = arith.constant 0 : index
    %43 = vector.load %arg10[%c0_25, %c0_26] : memref<16x32xf32, #tpu.memory_space<vmem>>, vector<16x32xf32>
    tpu.vector_store %arg10[%c0_25, %c0_26], %42 {strides = array<i32>} : memref<16x32xf32, #tpu.memory_space<vmem>>, vector<16x32xf32>,
    return
  }
  func.func @transform_0(%arg0: i32) -> (i32, i32) {
    %c0_i32 = arith.constant 0 : i32
    %c0_i32_0 = arith.constant 0 : i32
    return %arg0, %c0_i32 : i32, i32
  }
  func.func @transform_1(%arg0: i32) -> (i32, i32) {
    %c0_i32 = arith.constant 0 : i32
    %c0_i32_0 = arith.constant 0 : i32
    %c0_i32_1 = arith.constant 0 : i32
    return %c0_i32, %c0_i32_0 : i32, i32
  }
  func.func @transform_2(%arg0: i32) -> (i32, i32) {
    %c0_i32 = arith.constant 0 : i32
    %c0_i32_0 = arith.constant 0 : i32
    %c0_i32_1 = arith.constant 0 : i32
    return %c0_i32, %c0_i32_0 : i32, i32
  }
  func.func @transform_3(%arg0: i32) -> (i32, i32) {
    %c0_i32 = arith.constant 0 : i32
    %c0_i32_0 = arith.constant 0 : i32
    %c0_i32_1 = arith.constant 0 : i32
    return %c0_i32, %c0_i32_0 : i32, i32
  }
  func.func @transform_4(%arg0: i32) -> (i32, i32) {
    %c0_i32 = arith.constant 0 : i32
    %c0_i32_0 = arith.constant 0 : i32
    %c0_i32_1 = arith.constant 0 : i32
    return %c0_i32, %c0_i32_0 : i32, i32
  }
  func.func @transform_5(%arg0: i32) -> (i32, i32) {
    %c0_i32 = arith.constant 0 : i32
    %c0_i32_0 = arith.constant 0 : i32
    %c0_i32_1 = arith.constant 0 : i32
    return %c0_i32, %c0_i32_0 : i32, i32
  }
  func.func @transform_6(%arg0: i32) -> (i32, i32) {
    %c0_i32 = arith.constant 0 : i32
    %c0_i32_0 = arith.constant 0 : i32
    %c0_i32_1 = arith.constant 0 : i32
    return %c0_i32, %c0_i32_0 : i32, i32
  }
  func.func @transform_7(%arg0: i32) -> (i32, i32) {
    %c0_i32 = arith.constant 0 : i32
    %c0_i32_0 = arith.constant 0 : i32
    %c0_i32_1 = arith.constant 0 : i32
    return %c0_i32, %c0_i32_0 : i32, i32
  }
  func.func @transform_8(%arg0: i32) -> (i32, i32) {
    %c0_i32 = arith.constant 0 : i32
    %c0_i32_0 = arith.constant 0 : i32
    %c0_i32_1 = arith.constant 0 : i32
    return %c0_i32, %c0_i32_0 : i32, i32
  }
  func.func @transform_9(%arg0: i32) -> (i32, i32) {
    %c0_i32 = arith.constant 0 : i32
    %c0_i32_0 = arith.constant 0 : i32
    return %arg0, %c0_i32 : i32, i32
  }
}

</mosaic_0001>

<bundles_post_ra>
// kernel: kinet_backbone_fc.1
= control target key start
LH: loop header
LB: loop body
LE: loop exit
PB: predicated region body
PF: predicated region fallthrough
CT: control target
= control target key end

     0   :  { %14 = vsyncpa [#allocation3], 0  ;;  %s655_s0 = inlined_call_operand.hbm [shape: f32[16,32], index: 0, kind: input, shape index: {}]   ;;  %s656_s1 = inlined_call_operand.hbm [shape: bf16[32,32], index: 1, kind: input, shape index: {}]   ;;  %s657_s2 = inlined_call_operand.vmem [shape: f32[1,32], index: 2, kind: input, shape index: {}]   ;;  %s658_s3 = inlined_call_operand.hbm [shape: bf16[32,32], index: 3, kind: input, shape index: {}]   ;;  %s659_s4 = inlined_call_operand.vmem [shape: f32[1,32], index: 4, kind: input, shape index: {}]   ;;  %s660_s5 = inlined_call_operand.hbm [shape: bf16[32,32], index: 5, kind: input, shape index: {}]   ;;  %s661_s6 = inlined_call_operand.vmem [shape: f32[1,32], index: 6, kind: input, shape index: {}]   ;;  %s662_s7 = inlined_call_operand.vmem [shape: f32[1,32], index: 7, kind: input, shape index: {}]   ;;  %s663_s8 = inlined_call_operand.vmem [shape: f32[1,32], index: 8, kind: input, shape index: {}]   ;;  %s664_s9 = inlined_call_operand.hbm [shape: f32[16,32], index: 9, kind: output, shape index: {}]  }
   0x1   :  { %15 = vsyncpa [#allocation6], 0 }
   0x2   :  { %16 = vsyncpa [#allocation9], 0 }
   0x3   :  { %17 = vsyncpa [#allocation4], 0  ;;  %s540_s30 = smov [#allocation5]  }
   0x4   :  { %s35_s10 = sshll.u32 %s540_s30, 4  ;;  %s36_s10 = int_to_ptr.vmem [resolvable:$true] %s35_s10 }
   0x5   :  { %s440_s11 = scalar_lea.vmem %s36_s10, 256  ;;  %p445_p1 = scmp.lt.s32.totalorder %s36_s10, %s36_s10 }
   0x6   :  { %p441_p0 = scmp.ne.s32.totalorder %s36_s10, %s440_s11  ;;  %p446_p2 = scmp.lt.s32.totalorder %s440_s11, %s440_s11 }
   0x8   :  { %p447_p3 = por %p446_p2, %p445_p1 }
   0xa   :  { %p448_p4 = pnand %p447_p3, %p441_p0 }
   0xc   :  { %451 = shalt.err (!%p448_p4)
}
   0xd   :  { %s541_s12 = smov 64   ;;  %s542_s13 = smov 4  }
   0xe   :  { %41 = dma.hbm_to_vmem [thread:$0]  %s656_s1, 256, %s36_s10, [#allocation6], %s541_s12, %s541_s12, %s542_s13  }
   0xf   :  { %s543_s16 = smov [#allocation2]  }
  0x10   :  { %s23_s17 = sshll.u32 %s543_s16, 4  ;;  %s24_s17 = int_to_ptr.vmem [resolvable:$true] %s23_s17 }
  0x11   :  { %s460_s18 = scalar_lea.vmem %s24_s17, 256  ;;  %p465_p6 = scmp.lt.s32.totalorder %s24_s17, %s24_s17 }
  0x12   :  { %p461_p5 = scmp.ne.s32.totalorder %s24_s17, %s460_s18  ;;  %p466_p7 = scmp.lt.s32.totalorder %s460_s18, %s460_s18 }
  0x14   :  { %p467_p8 = por %p466_p7, %p465_p6 }
  0x16   :  { %p468_p9 = pnand %p467_p8, %p461_p5 }
  0x18   :  { %471 = shalt.err (!%p468_p9)
}
  0x19   :  { %s544_s19 = smov 128   ;;  %s545_s20 = smov 8  }
  0x1a   :  { %29 = dma.hbm_to_vmem [thread:$0]  %s655_s0, 256, %s24_s17, [#allocation3], %s544_s19, %s544_s19, %s545_s20  }
  0x1b   :  { %s546_s1 = smov [#allocation7]   ;;  %s547_s24 = smov [#allocation8]  }
  0x1c   :  { %s49_s23 = sshll.u32 %s546_s1, 4  ;;  %s63_s25 = sshll.u32 %s547_s24, 4  ;;  %s50_s23 = int_to_ptr.vmem [resolvable:$true] %s49_s23  ;;  %s64_s25 = int_to_ptr.vmem [resolvable:$true] %s63_s25 }
  0x1d   :  { %s480_s26 = scalar_lea.vmem %s50_s23, 256  ;;  %p485_p11 = scmp.lt.s32.totalorder %s50_s23, %s50_s23 }
  0x1e   :  { %p481_p10 = scmp.ne.s32.totalorder %s50_s23, %s480_s26  ;;  %p486_p12 = scmp.lt.s32.totalorder %s480_s26, %s480_s26 }
  0x20   :  { %p487_p13 = por %p486_p12, %p485_p11 }
  0x22   :  { %p488_p0 = pnand %p487_p13, %p481_p10 }
  0x24   :  { %491 = shalt.err (!%p488_p0)
}
  0x25   :  { %55 = dma.hbm_to_vmem [thread:$0]  %s658_s3, 256, %s50_s23, [#allocation6], %s541_s12, %s541_s12, %s542_s13  }
  0x26   :  { %s500_s0 = scalar_lea.vmem %s64_s25, 256  ;;  %p505_p2 = scmp.lt.s32.totalorder %s64_s25, %s64_s25 }
  0x27   :  { %p501_p1 = scmp.ne.s32.totalorder %s64_s25, %s500_s0  ;;  %p506_p3 = scmp.lt.s32.totalorder %s500_s0, %s500_s0 }
  0x29   :  { %p507_p4 = por %p506_p3, %p505_p2 }
  0x2b   :  { %p508_p5 = pnand %p507_p4, %p501_p1 }
  0x2d   :  { %511 = shalt.err (!%p508_p5)
}
  0x2e   :  { %69 = dma.hbm_to_vmem [thread:$0]  %s660_s5, 256, %s64_s25, [#allocation9], %s541_s12, %s541_s12, %s542_s13  }
  0x2f   :  { %532 = dma.done.wait [#allocation3], 256  }
  0x30   :  { %533 = vsyncadd [#allocation3], 4294967040 }
  0x31   :  { %534 = dma.done.wait [#allocation6], 512  }
  0x32   :  { %535 = vsyncadd [#allocation6], 4294966784 }
  0x33   :  { %536 = dma.done.wait [#allocation9], 256  }
  0x34   :  { %537 = vsyncadd [#allocation9], 4294967040  ;;  %v548_v0 = vmov 0.0   ;;  %vm549_vm0 = vmmov 0   ;;  %v422_v1 = vld [vmem:[#allocation5 + $0x8] sm:$0xff]   ;;  %v423_v2 = vld [vmem:[#allocation5] sm:$0xff]  }
  0x35   :  { %387 = vmatprep.subr.bf16.mxu0 %v548_v0  ;;  %391 = vmatprep.mubr.msk.bf16.mxu0 %vm549_vm0, %v548_v0  ;;  %v89_v3 = vld [vmem:[#allocation2] sm:$0xff]  ;;  %v90_v4 = vld [vmem:[#allocation2 + $0x8] sm:$0xff]  ;;  %vm115_vm1 = vcmask 261120   ;;  %v426_v16 = vld [vmem:[#allocation8 + $0x8] sm:$0xff]   ;;  %s550_s15 = smov [#allocation10]  }
  0x36   :  { %395 = vmatprep.subr.bf16.mxu1 %v548_v0  ;;  %399 = vmatprep.mubr.msk.bf16.mxu1 %vm549_vm0, %v548_v0  ;;  %v91_v5 = vpack.c.bf16 %v90_v4, %v89_v3  ;;  %v424_v6 = vld [vmem:[#allocation7 + $0x8] sm:$0xff]   ;;  %v425_v7 = vld [vmem:[#allocation7] sm:$0xff]   ;;  %v427_v17 = vld [vmem:[#allocation8] sm:$0xff]   ;;  %s350_s16 = sshll.u32 %s550_s15, 4  ;;  %s351_s16 = int_to_ptr.vmem [resolvable:$true] %s350_s16 }
  0x37   :  { %388 = vmatpush3.bf16.msra.mxu0 %v422_v1  ;;  %396 = vmatpush3.bf16.msra.mxu1 %v424_v6  ;;  %v364_v9 = vld [vmem:[%s657_s2] ss:$0 sm:$0xff]  ;;  %s512_s17 = scalar_lea.vmem %s351_s16, 256  ;;  %p517_p7 = scmp.lt.s32.totalorder %s351_s16, %s351_s16 }
  0x38   :  { %389 = vmatprep.subr.bf16.mxu0 %v548_v0  ;;  %397 = vmatprep.subr.bf16.mxu1 %v548_v0  ;;  %v368_v18 = vld [vmem:[%s659_s4] ss:$0 sm:$0xff]  ;;  %p513_p6 = scmp.ne.s32.totalorder %s351_s16, %s512_s17  ;;  %p518_p8 = scmp.lt.s32.totalorder %s512_s17, %s512_s17 }
  0x39   :  { %v372_v28 = vld [vmem:[%s661_s6] ss:$0 sm:$0xff] }
  0x3a   :  { %v376_v54 = vld [vmem:[%s662_s7] ss:$0 sm:$0xff]  ;;  %p519_p9 = por %p518_p8, %p517_p7 }
  0x3b   :  { %390 = vmatpush3.bf16.msra.mxu0 %v423_v2  ;;  %398 = vmatpush3.bf16.msra.mxu1 %v425_v7  ;;  %v377_v56 = vld [vmem:[%s663_s8] ss:$0 sm:$0xff] }
  0x3c   :  { %403 = vmatprep.subr.bf16.mxu0 %v548_v0  ;;  %p520_p10 = pnand %p519_p9, %p513_p6 }
  0x3e   :  { %392 = vmatmul.mubr.msk.bf16.vlgmr.msra.gmra.mxu0 %vm115_vm1, %v91_v5 }
  0x3f   :  { %407 = vmatprep.mubr.msk.bf16.mxu0 %vm549_vm0, %v548_v0  ;;  %404 = vmatpush3.bf16.msra.mxu0 %v426_v16 }
  0x40   :  { %405 = vmatprep.subr.bf16.mxu0 %v548_v0 }
  0x43   :  { %406 = vmatpush3.bf16.msra.mxu0 %v427_v17 }
  0xfe   :  { %v153_v8 = vpop.f32.mrf.mxu0 }
  0xff   :  { %v154_v12 = vadd.f32 %v364_v9, %v153_v8 }
 0x100   :  { %v393_v10 = vpop.f32.mrf.mxu0 }
 0x102   :  { %v156_v11 = vpop.f32.mrf.mxu0 }
 0x103   :  { %v157_v13 = vadd.f32 %v364_v9, %v156_v11 }
 0x104   :  { %v394_v14 = vpop.f32.mrf.mxu0 }
 0x105   :  { %v160_v15 = vpack.c.bf16 %v157_v13, %v154_v12 }
 0x107   :  { %400 = vmatmul.mubr.msk.bf16.vlgmr.msra.gmra.mxu1 %vm115_vm1, %v160_v15 }
 0x1c7   :  { %v221_v19 = vpop.f32.mrf.mxu1 }
 0x1c8   :  { %v222_v21 = vadd.f32 %v368_v18, %v221_v19 }
 0x1c9   :  { %v401_v20 = vpop.f32.mrf.mxu1 }
 0x1ca   :  { %v228_v25 = vmax.f32 %v222_v21, 0.0 }
 0x1cb   :  { %v224_v22 = vpop.f32.mrf.mxu1 }
 0x1cc   :  { %v225_v23 = vadd.f32 %v368_v18, %v224_v22 }
 0x1cd   :  { %v402_v24 = vpop.f32.mrf.mxu1 }
 0x1ce   :  { %v229_v26 = vmax.f32 %v225_v23, 0.0 }
 0x1d0   :  { %v230_v27 = vpack.c.bf16 %v229_v26, %v228_v25 }
 0x1d2   :  { %408 = vmatmul.mubr.msk.bf16.vlgmr.msra.gmra.mxu0 %vm115_vm1, %v230_v27 }
 0x292   :  { %v291_v29 = vpop.f32.mrf.mxu0 }
 0x293   :  { %v292_v30 = vadd.f32 %v372_v28, %v291_v29 }
 0x294   :  { %v409_v31 = vpop.f32.mrf.mxu0 }
 0x295   :  { %v298_v32 = vsel %vm115_vm1, %v292_v30, 0.0 }
 0x296   :  { %299 = vadd.xlane.f32.xlu0 %v298_v32  ;;  %v294_v33 = vpop.f32.mrf.mxu0 }
 0x297   :  { %v295_v34 = vadd.f32 %v372_v28, %v294_v33 }
 0x298   :  { %v410_v35 = vpop.f32.mrf.mxu0 }
 0x299   :  { %v301_v36 = vsel %vm115_vm1, %v295_v34, 0.0 }
 0x29a   :  { %302 = vadd.xlane.f32.xlu0 %v301_v36 }
 0x31f   :  { %v300_v37 = vpop.xlane.xlu0 %299 }
 0x320   :  { %v305_v38 = vmul.f32 0.03125, %v300_v37 }
 0x322   :  { %v307_v39 = vsub.f32 %v292_v30, %v305_v38 }
 0x323   :  { %v303_v40 = vpop.xlane.xlu0 %302 }
 0x324   :  { %v306_v41 = vmul.f32 0.03125, %v303_v40  ;;  %v309_v42 = vmul.f32 %v307_v39, %v307_v39 }
 0x326   :  { %v308_v43 = vsub.f32 %v295_v34, %v306_v41  ;;  %v311_v44 = vsel %vm115_vm1, %v309_v42, 0.0 }
 0x327   :  { %312 = vadd.xlane.f32.xlu1 %v311_v44 }
 0x328   :  { %v310_v45 = vmul.f32 %v308_v43, %v308_v43 }
 0x32a   :  { %v314_v46 = vsel %vm115_vm1, %v310_v45, 0.0 }
 0x32b   :  { %315 = vadd.xlane.f32.xlu1 %v314_v46 }
 0x3b0   :  { %v313_v47 = vpop.xlane.xlu1 %312 }
 0x3b1   :  { %v317_v48 = vmul.f32 0.03125, %v313_v47 }
 0x3b3   :  { %v319_v49 = vadd.f32 1e-05, %v317_v48 }
 0x3b4   :  { %v316_v50 = vpop.xlane.xlu1 %315 }
 0x3b5   :  { %428 = vrsqrt.f32 %v319_v49  ;;  %v318_v51 = vmul.f32 0.03125, %v316_v50 }
 0x3b7   :  { %v320_v52 = vadd.f32 1e-05, %v318_v51 }
 0x3b9   :  { %430 = vrsqrt.f32 %v320_v52 }
 0x3c2   :  { %v429_v53 = vpop.eup %428 }
 0x3c3   :  { %v323_v55 = vmul.f32 %v429_v53, %v307_v39 }
 0x3c5   :  { %v332_v57 = vmul.f32 %v376_v54, %v323_v55 }
 0x3c6   :  { %v431_v58 = vpop.eup %430 }
 0x3c7   :  { %v324_v59 = vmul.f32 %v431_v58, %v308_v43  ;;  %v341_v60 = vadd.f32 %v377_v56, %v332_v57 }
 0x3c9   :  { %v333_v61 = vmul.f32 %v376_v54, %v324_v59  ;;  %343 = vst.msk [vmem:[#allocation10] sm:$0xff] %vm115_vm1, %v341_v60 }
 0x3cb   :  { %v342_v62 = vadd.f32 %v377_v56, %v333_v61 }
 0x3cd   :  { %344 = vst.msk [vmem:[#allocation10 + $0x8] sm:$0xff] %vm115_vm1, %v342_v62 }
 0x3ce   :  { %523 = shalt.err (!%p520_p10)
}
 0x3cf   :  { %356 = dma.vmem_to_hbm [thread:$0]  %s351_s16, 256, %s664_s9, [#allocation4], %s544_s19, %s544_s19, %s545_s20  }
 0x3d0   :  { %538 = dma.done.wait [#allocation4], 256  }
 0x3d1   :  { %539 = vsyncadd [#allocation4], 4294967040 }
 0x3d2   :  { %360 = vsyncpa [#allocation3], 1 }
 0x3d3   :  { %361 = vsyncpa [#allocation6], 1 }
 0x3d4   :  { %362 = vsyncpa [#allocation9], 1 }
 0x3d5   :  { %363 = vsyncpa [#allocation4], 1 }

</bundles_post_ra>
